<compile_context>
chip_gen: v6e
topology: v6e:2x2x1
jax: 0.10.0
libtpu: 0.0.40
codegen_flags: <defaults>
</compile_context>

<pallas_src>
import jax
import jax.numpy as jnp
from jax.experimental import pallas as pl
from jax.experimental.pallas import tpu as pltpu

# LunarLander-v2 dimensions: observation dim 8, action dim 4, fc1=fc2=64.
STATE_SIZE = 8
ACTION_SIZE = 4
FC1_UNITS = 64
FC2_UNITS = 64

# Padded (lane-dense) dims used for the in-kernel compute only.
H_PAD = 128     # both hidden layers padded 64 -> 128
OUT_PAD = 128   # action dim padded 4 -> 128 for the last MXU tile

DEFAULT_BLOCK_B = 2048  # batch tile (multiple of 8)


def _round_up(n, m):
    return (n + m - 1) // m * m


def qnetwork_kernel(x_ref, w1_ref, b1_ref, w2_ref, b2_ref, w3_ref, b3_ref, o_ref):
    # x : [TB, STATE_SIZE]            (bf16 or f32)
    # w1: [STATE_SIZE, H_PAD]         b1: [1, H_PAD]  (f32)
    # w2: [H_PAD, H_PAD]              b2: [1, H_PAD]  (f32)
    # w3: [H_PAD, OUT_PAD]            b3: [1, OUT_PAD](f32)
    # o : [TB, ACTION_SIZE]           (f32)
    x = x_ref[...]

    # All matmuls are lane-dense (width 128) and accumulate in f32.
    h1 = jnp.dot(x, w1_ref[...], preferred_element_type=jnp.float32) + b1_ref[...]
    h1 = jnp.maximum(h1, 0.0)

    h2 = jnp.dot(h1.astype(w2_ref.dtype), w2_ref[...],
                 preferred_element_type=jnp.float32) + b2_ref[...]
    h2 = jnp.maximum(h2, 0.0)

    q = jnp.dot(h2.astype(w3_ref.dtype), w3_ref[...],
                preferred_element_type=jnp.float32) + b3_ref[...]

    # Only the real action columns leave the kernel (narrow store, but the
    # HBM writeback is 32x smaller than the padded slab).
    o_ref[...] = q[:, :ACTION_SIZE].astype(o_ref.dtype)


def qnetwork_forward(x, padded_params, *, block_b=DEFAULT_BLOCK_B):
    """x: [B, STATE_SIZE]. padded_params: output of prepare_params().
    Returns [B, ACTION_SIZE] float32 Q-values (fc3 output, no activation)."""
    w1p, b1p, w2p, b2p, w3p, b3p = padded_params
    B = x.shape[0]
    assert x.shape[1] == STATE_SIZE, x.shape

    compute_dtype = w1p.dtype
    if x.dtype != compute_dtype:
        # Ideally the caller (replay buffer) already stores states in
        # compute_dtype so this cast (an extra XLA op) disappears.
        x = x.astype(compute_dtype)

    # Batch tile: multiple of 8, no larger than needed; ragged last tile is
    # handled by Pallas masking (no jnp.pad of x, no output slice).
    TB = min(block_b, _round_up(B, 8))
    grid = (pl.cdiv(B, TB),)

    const = lambda shape: pl.BlockSpec(shape, lambda i: (0, 0))

    param_bytes = sum(int(p.size) * p.dtype.itemsize for p in padded_params)
    cost = pl.CostEstimate(
        flops=2 * B * (STATE_SIZE * H_PAD + H_PAD * H_PAD + H_PAD * OUT_PAD),
        transcendentals=0,
        bytes_accessed=B * STATE_SIZE * x.dtype.itemsize
        + B * ACTION_SIZE * 4
        + param_bytes,
    )

    return pl.pallas_call(
        qnetwork_kernel,
        out_shape=jax.ShapeDtypeStruct((B, ACTION_SIZE), jnp.float32),
        grid=grid,
        in_specs=[
            pl.BlockSpec((TB, STATE_SIZE), lambda i: (i, 0)),  # x: streamed per tile
            const((STATE_SIZE, H_PAD)),                        # weights: resident
            const((1, H_PAD)),
            const((H_PAD, H_PAD)),
            const((1, H_PAD)),
            const((H_PAD, OUT_PAD)),
            const((1, OUT_PAD)),
        ],
        out_specs=pl.BlockSpec((TB, ACTION_SIZE), lambda i: (i, 0)),
        compiler_params=pltpu.CompilerParams(
            dimension_semantics=("parallel",)),
        cost_estimate=cost,
    )(x, w1p, b1p, w2p, b2p, w3p, b3p)


def init_params(key):
    """PyTorch nn.Linear-style init: uniform(-1/sqrt(fan_in), 1/sqrt(fan_in)),
    weights stored in PyTorch layout [out_features, in_features]."""
    keys = jax.random.split(key, 6)

    def linear(kw, kb, fan_in, fan_out):
        bound = 1.0 / jnp.sqrt(float(fan_in))
        w = jax.random.uniform(kw, (fan_out, fan_in), jnp.float32, -bound, bound)
        b = jax.random.uniform(kb, (fan_out,), jnp.float32, -bound, bound)
        return w, b

    p1 = linear(keys[0], keys[1], STATE_SIZE, FC1_UNITS)
    p2 = linear(keys[2], keys[3], FC1_UNITS, FC2_UNITS)
    p3 = linear(keys[4], keys[5], FC2_UNITS, ACTION_SIZE)
    return p1, p2, p3


def prepare_params(params, compute_dtype=jnp.bfloat16):
    """Transpose to [in, out], zero-pad to lane-dense shapes, and cast weights
    to the MXU compute dtype (biases stay f32; accumulation is f32).
    Zero padding is exact: ReLU(0)=0 and padded rows/cols/biases are zero."""
    (w1, b1), (w2, b2), (w3, b3) = params

    def pad_to(a, shape):
        pads = [(0, t - s) for s, t in zip(a.shape, shape)]
        return jnp.pad(a, pads)

    w1p = pad_to(w1.T, (STATE_SIZE, H_PAD)).astype(compute_dtype)  # [8, 128]
    b1p = pad_to(b1[None, :], (1, H_PAD)).astype(jnp.float32)      # [1, 128]
    w2p = pad_to(w2.T, (H_PAD, H_PAD)).astype(compute_dtype)       # [128, 128]
    b2p = pad_to(b2[None, :], (1, H_PAD)).astype(jnp.float32)      # [1, 128]
    w3p = pad_to(w3.T, (H_PAD, OUT_PAD)).astype(compute_dtype)     # [128, 128]
    b3p = pad_to(b3[None, :], (1, OUT_PAD)).astype(jnp.float32)    # [1, 128]
    return w1p, b1p, w2p, b2p, w3p, b3p


def reference_forward(x, params):
    (w1, b1), (w2, b2), (w3, b3) = params
    h1 = jnp.maximum(x @ w1.T + b1, 0.0)
    h2 = jnp.maximum(h1 @ w2.T + b2, 0.0)
    return h2 @ w3.T + b3


if __name__ == "__main__":
    key = jax.random.PRNGKey(0)
    kx, kp, kx2 = jax.random.split(key, 3)

    params = init_params(kp)

    # Small demo batch (ragged: not a multiple of the batch tile).
    B = 2
    x = jax.random.normal(kx, (B, STATE_SIZE), jnp.float32)
    ref = reference_forward(x, params)

    # 1) Optimized bf16-MXU data path (default).
    out_bf16 = qnetwork_forward(x, prepare_params(params, jnp.bfloat16))
    out_bf16 = jax.block_until_ready(out_bf16)
    assert out_bf16.shape == (B, ACTION_SIZE), out_bf16.shape
    assert out_bf16.dtype == jnp.float32, out_bf16.dtype
    assert jnp.allclose(out_bf16, ref, atol=5e-2, rtol=5e-2), "bf16 path mismatch"

    # 2) Exact f32 path (same kernel, f32 operands).
    out_f32 = qnetwork_forward(x, prepare_params(params, jnp.float32))
    out_f32 = jax.block_until_ready(out_f32)
    assert jnp.allclose(out_f32, ref, atol=1e-5, rtol=1e-5), "f32 path mismatch"

    # 3) Multi-tile + ragged last tile (exercises the masked tail load/store).
    B2 = 300
    x2 = jax.random.normal(kx2, (B2, STATE_SIZE), jnp.float32)
    ref2 = reference_forward(x2, params)
    out2 = qnetwork_forward(x2, prepare_params(params, jnp.bfloat16), block_b=128)
    out2 = jax.block_until_ready(out2)
    assert out2.shape == (B2, ACTION_SIZE), out2.shape
    assert jnp.allclose(out2, ref2, atol=5e-2, rtol=5e-2), "ragged multi-tile mismatch"

    print("KERNEL_OK")
</pallas_src>

<mosaic_0001>
module attributes {stable_mosaic.version = 11 : i64} {
  func.func @qnetwork_kernel(%arg0: i32, %arg1: memref<8x8xbf16, #tpu.memory_space<vmem>>, %arg2: memref<8x128xbf16, #tpu.memory_space<vmem>>, %arg3: memref<1x128xf32, #tpu.memory_space<vmem>>, %arg4: memref<128x128xbf16, #tpu.memory_space<vmem>>, %arg5: memref<1x128xf32, #tpu.memory_space<vmem>>, %arg6: memref<128x128xbf16, #tpu.memory_space<vmem>>, %arg7: memref<1x128xf32, #tpu.memory_space<vmem>>, %arg8: memref<8x4xf32, #tpu.memory_space<vmem>>) attributes {dimension_semantics = [#tpu.dimension_semantics<parallel>], iteration_bounds = array<i64: 1>, scalar_prefetch = 0 : i64, scratch_operands = 0 : i64, tpu.core_type = #tpu.core_type<tc>, window_params = [{transform_indices = @transform_0, window_bounds = array<i64: 8, 8>}, {pipeline_mode = #tpu.pipeline_mode<synchronous>, transform_indices = @transform_1, window_bounds = array<i64: 8, 128>}, {pipeline_mode = #tpu.pipeline_mode<synchronous>, transform_indices = @transform_2, window_bounds = array<i64: 1, 128>}, {pipeline_mode = #tpu.pipeline_mode<synchronous>, transform_indices = @transform_3, window_bounds = array<i64: 128, 128>}, {pipeline_mode = #tpu.pipeline_mode<synchronous>, transform_indices = @transform_4, window_bounds = array<i64: 1, 128>}, {pipeline_mode = #tpu.pipeline_mode<synchronous>, transform_indices = @transform_5, window_bounds = array<i64: 128, 128>}, {pipeline_mode = #tpu.pipeline_mode<synchronous>, transform_indices = @transform_6, window_bounds = array<i64: 1, 128>}, {transform_indices = @transform_7, window_bounds = array<i64: 8, 4>}]} {
    %c0 = arith.constant 0 : index
    %c0_0 = arith.constant 0 : index
    %0 = vector.load %arg1[%c0, %c0_0] : memref<8x8xbf16, #tpu.memory_space<vmem>>, vector<8x8xbf16>
    %c0_1 = arith.constant 0 : index
    %c0_2 = arith.constant 0 : index
    %1 = vector.load %arg2[%c0_1, %c0_2] : memref<8x128xbf16, #tpu.memory_space<vmem>>, vector<8x128xbf16>
    %cst = arith.constant dense<0.000000e+00> : vector<8x128xf32>
    %2 = tpu.matmul %0, %1, %cst {dimension_numbers = #tpu.dot_dimension_numbers<[1], [0], [0], [1], [0, 0, 1, 1], [], []>} : vector<8x8xbf16>, vector<8x128xbf16>, vector<8x128xf32> -> vector<8x128xf32>
    %c0_3 = arith.constant 0 : index
    %c0_4 = arith.constant 0 : index
    %3 = vector.load %arg3[%c0_3, %c0_4] : memref<1x128xf32, #tpu.memory_space<vmem>>, vector<1x128xf32>
    %4 = vector.broadcast %3 : vector<1x128xf32> to vector<8x128xf32>
    %5 = arith.addf %2, %4 : vector<8x128xf32>
    %cst_5 = arith.constant 0.000000e+00 : f32
    %6 = vector.broadcast %cst_5 : f32 to vector<8x128xf32>
    %7 = arith.maximumf %5, %6 : vector<8x128xf32>
    %8 = arith.truncf %7 : vector<8x128xf32> to vector<8x128xbf16>
    %c0_6 = arith.constant 0 : index
    %c0_7 = arith.constant 0 : index
    %9 = vector.load %arg4[%c0_6, %c0_7] : memref<128x128xbf16, #tpu.memory_space<vmem>>, vector<128x128xbf16>
    %cst_8 = arith.constant dense<0.000000e+00> : vector<8x128xf32>
    %10 = tpu.matmul %8, %9, %cst_8 {dimension_numbers = #tpu.dot_dimension_numbers<[1], [0], [0], [1], [0, 0, 1, 1], [], []>} : vector<8x128xbf16>, vector<128x128xbf16>, vector<8x128xf32> -> vector<8x128xf32>
    %c0_9 = arith.constant 0 : index
    %c0_10 = arith.constant 0 : index
    %11 = vector.load %arg5[%c0_9, %c0_10] : memref<1x128xf32, #tpu.memory_space<vmem>>, vector<1x128xf32>
    %12 = vector.broadcast %11 : vector<1x128xf32> to vector<8x128xf32>
    %13 = arith.addf %10, %12 : vector<8x128xf32>
    %cst_11 = arith.constant 0.000000e+00 : f32
    %14 = vector.broadcast %cst_11 : f32 to vector<8x128xf32>
    %15 = arith.maximumf %13, %14 : vector<8x128xf32>
    %16 = arith.truncf %15 : vector<8x128xf32> to vector<8x128xbf16>
    %c0_12 = arith.constant 0 : index
    %c0_13 = arith.constant 0 : index
    %17 = vector.load %arg6[%c0_12, %c0_13] : memref<128x128xbf16, #tpu.memory_space<vmem>>, vector<128x128xbf16>
    %cst_14 = arith.constant dense<0.000000e+00> : vector<8x128xf32>
    %18 = tpu.matmul %16, %17, %cst_14 {dimension_numbers = #tpu.dot_dimension_numbers<[1], [0], [0], [1], [0, 0, 1, 1], [], []>} : vector<8x128xbf16>, vector<128x128xbf16>, vector<8x128xf32> -> vector<8x128xf32>
    %c0_15 = arith.constant 0 : index
    %c0_16 = arith.constant 0 : index
    %19 = vector.load %arg7[%c0_15, %c0_16] : memref<1x128xf32, #tpu.memory_space<vmem>>, vector<1x128xf32>
    %20 = vector.broadcast %19 : vector<1x128xf32> to vector<8x128xf32>
    %21 = arith.addf %18, %20 : vector<8x128xf32>
    %22 = vector.extract_strided_slice %21 {offsets = [0, 0], sizes = [8, 4], strides = [1, 1]} : vector<8x128xf32> to vector<8x4xf32>
    %c0_17 = arith.constant 0 : index
    %c0_18 = arith.constant 0 : index
    %23 = vector.load %arg8[%c0_17, %c0_18] : memref<8x4xf32, #tpu.memory_space<vmem>>, vector<8x4xf32>
    tpu.vector_store %arg8[%c0_17, %c0_18], %22 {strides = array<i32>} : memref<8x4xf32, #tpu.memory_space<vmem>>, vector<8x4xf32>,
    return
  }
  func.func @transform_0(%arg0: i32) -> (i32, i32) {
    %c0_i32 = arith.constant 0 : i32
    %c0_i32_0 = arith.constant 0 : i32
    return %arg0, %c0_i32 : i32, i32
  }
  func.func @transform_1(%arg0: i32) -> (i32, i32) {
    %c0_i32 = arith.constant 0 : i32
    %c0_i32_0 = arith.constant 0 : i32
    %c0_i32_1 = arith.constant 0 : i32
    return %c0_i32, %c0_i32_0 : i32, i32
  }
  func.func @transform_2(%arg0: i32) -> (i32, i32) {
    %c0_i32 = arith.constant 0 : i32
    %c0_i32_0 = arith.constant 0 : i32
    %c0_i32_1 = arith.constant 0 : i32
    return %c0_i32, %c0_i32_0 : i32, i32
  }
  func.func @transform_3(%arg0: i32) -> (i32, i32) {
    %c0_i32 = arith.constant 0 : i32
    %c0_i32_0 = arith.constant 0 : i32
    %c0_i32_1 = arith.constant 0 : i32
    return %c0_i32, %c0_i32_0 : i32, i32
  }
  func.func @transform_4(%arg0: i32) -> (i32, i32) {
    %c0_i32 = arith.constant 0 : i32
    %c0_i32_0 = arith.constant 0 : i32
    %c0_i32_1 = arith.constant 0 : i32
    return %c0_i32, %c0_i32_0 : i32, i32
  }
  func.func @transform_5(%arg0: i32) -> (i32, i32) {
    %c0_i32 = arith.constant 0 : i32
    %c0_i32_0 = arith.constant 0 : i32
    %c0_i32_1 = arith.constant 0 : i32
    return %c0_i32, %c0_i32_0 : i32, i32
  }
  func.func @transform_6(%arg0: i32) -> (i32, i32) {
    %c0_i32 = arith.constant 0 : i32
    %c0_i32_0 = arith.constant 0 : i32
    %c0_i32_1 = arith.constant 0 : i32
    return %c0_i32, %c0_i32_0 : i32, i32
  }
  func.func @transform_7(%arg0: i32) -> (i32, i32) {
    %c0_i32 = arith.constant 0 : i32
    %c0_i32_0 = arith.constant 0 : i32
    return %arg0, %c0_i32 : i32, i32
  }
}

</mosaic_0001>

<bundles_post_ra>
// kernel: tpu_custom_call.1
= control target key start
LH: loop header
LB: loop body
LE: loop exit
PB: predicated region body
PF: predicated region fallthrough
CT: control target
= control target key end

     0   :  { %12 = vsyncpa [#allocation3], 0  ;;  %s741_s0 = inlined_call_operand.hbm [shape: bf16[2,8], index: 0, kind: input, shape index: {}]   ;;  %s742_s1 = inlined_call_operand.hbm [shape: bf16[8,128], index: 1, kind: input, shape index: {}]   ;;  %s743_s2 = inlined_call_operand.vmem [shape: f32[1,128], index: 2, kind: input, shape index: {}]   ;;  %s744_s3 = inlined_call_operand.hbm [shape: bf16[128,128], index: 3, kind: input, shape index: {}]   ;;  %s745_s4 = inlined_call_operand.vmem [shape: f32[1,128], index: 4, kind: input, shape index: {}]   ;;  %s746_s5 = inlined_call_operand.hbm [shape: bf16[128,128], index: 5, kind: input, shape index: {}]   ;;  %s747_s6 = inlined_call_operand.vmem [shape: f32[1,128], index: 6, kind: input, shape index: {}]   ;;  %s748_s7 = inlined_call_operand.hbm [shape: f32[2,4], index: 7, kind: output, shape index: {}]  }
   0x1   :  { %13 = vsyncpa [#allocation6], 0 }
   0x2   :  { %14 = vsyncpa [#allocation9], 0 }
   0x3   :  { %15 = vsyncpa [#allocation4], 0 }
   0x4   :  { %20 = vsyncadd [#allocation3], 48  ;;  %s640_s24 = smov [#allocation5]   ;;  %s641_s26 = smov [#allocation2]  }
   0x5   :  { %s34_s25 = sshll.u32 %s640_s24, 4  ;;  %s21_s27 = sshll.u32 %s641_s26, 4  ;;  %s35_s25 = int_to_ptr.vmem [resolvable:$true] %s34_s25  ;;  %s22_s27 = int_to_ptr.vmem [resolvable:$true] %s21_s27 }
   0x6   :  { %s540_s28 = scalar_lea.vmem %s35_s25, 64  ;;  %p545_p1 = scmp.lt.s32.totalorder %s35_s25, %s35_s25 }
   0x7   :  { %p541_p0 = scmp.ne.s32.totalorder %s35_s25, %s540_s28  ;;  %p546_p2 = scmp.lt.s32.totalorder %s540_s28, %s540_s28 }
   0x9   :  { %p547_p3 = por %p546_p2, %p545_p1 }
   0xb   :  { %p548_p4 = pnand %p547_p3, %p541_p0 }
   0xd   :  { %551 = shalt.err (!%p548_p4)
}
   0xe   :  { %37 = dma.hbm_to_vmem [thread:$0]  %s742_s1, 64, %s35_s25, [#allocation6]  }
   0xf   :  { %s560_s8 = scalar_lea.vmem %s22_s27, 16  ;;  %s564_s9 = scalar_lea.vmem %s22_s27, 64 }
  0x10   :  { %p561_p5 = scmp.ne.s32.totalorder %s22_s27, %s560_s8  ;;  %p565_p6 = scmp.lt.s32.totalorder %s22_s27, %s22_s27 }
  0x11   :  { %p566_p7 = scmp.lt.s32.totalorder %s564_s9, %s560_s8 }
  0x13   :  { %p567_p8 = por %p566_p7, %p565_p6 }
  0x15   :  { %p568_p9 = pnand %p567_p8, %p561_p5 }
  0x17   :  { %571 = shalt.err (!%p568_p9)
}
  0x18   :  { %s642_s10 = smov 16   ;;  %s643_s11 = smov 1  }
  0x19   :  { %27 = dma.hbm_to_vmem [thread:$0]  %s741_s0, 16, %s22_s27, [#allocation3], %s642_s10, %s642_s10, %s643_s11  }
  0x1a   :  { %s644_s14 = smov [#allocation7]  }
  0x1b   :  { %s45_s15 = sshll.u32 %s644_s14, 4  ;;  %s46_s15 = int_to_ptr.vmem [resolvable:$true] %s45_s15 }
  0x1c   :  { %s580_s16 = scalar_lea.vmem %s46_s15, 1024  ;;  %p585_p11 = scmp.lt.s32.totalorder %s46_s15, %s46_s15 }
  0x1d   :  { %p581_p10 = scmp.ne.s32.totalorder %s46_s15, %s580_s16  ;;  %p586_p12 = scmp.lt.s32.totalorder %s580_s16, %s580_s16 }
  0x1f   :  { %p587_p13 = por %p586_p12, %p585_p11 }
  0x21   :  { %p588_p0 = pnand %p587_p13, %p581_p10 }
  0x23   :  { %591 = shalt.err (!%p588_p0)
}
  0x24   :  { %s645_s1 = smov 64   ;;  %s646_s17 = smov 4  }
  0x25   :  { %51 = dma.hbm_to_vmem [thread:$0]  %s744_s3, 1024, %s46_s15, [#allocation6], %s645_s1, %s645_s1, %s646_s17  }
  0x26   :  { %s647_s20 = smov [#allocation8]  }
  0x27   :  { %s59_s21 = sshll.u32 %s647_s20, 4  ;;  %s60_s21 = int_to_ptr.vmem [resolvable:$true] %s59_s21 }
  0x28   :  { %s600_s0 = scalar_lea.vmem %s60_s21, 1024  ;;  %p605_p2 = scmp.lt.s32.totalorder %s60_s21, %s60_s21 }
  0x29   :  { %p601_p1 = scmp.ne.s32.totalorder %s60_s21, %s600_s0  ;;  %p606_p3 = scmp.lt.s32.totalorder %s600_s0, %s600_s0 }
  0x2b   :  { %p607_p4 = por %p606_p3, %p605_p2 }
  0x2d   :  { %p608_p5 = pnand %p607_p4, %p601_p1 }
  0x2f   :  { %611 = shalt.err (!%p608_p5)
}
  0x30   :  { %65 = dma.hbm_to_vmem [thread:$0]  %s746_s5, 1024, %s60_s21, [#allocation9], %s645_s1, %s645_s1, %s646_s17  }
  0x31   :  { %632 = dma.done.wait [#allocation3], 64  }
  0x32   :  { %633 = vsyncadd [#allocation3], 4294967232 }
  0x33   :  { %634 = dma.done.wait [#allocation6], 1088  }
  0x34   :  { %635 = vsyncadd [#allocation6], 4294966208 }
  0x35   :  { %636 = dma.done.wait [#allocation9], 1024  }
  0x36   :  { %637 = vsyncadd [#allocation9], 4294966272  ;;  %v102_v0 = vlaneseq  ;;  %v648_v1 = vmov 0.0   ;;  %vm649_vm0 = vmmov 0   ;;  %v650_v2 = vmov 1966171168  }
  0x37   :  { %456 = vmatprep.subr.bf16.mxu0 %v648_v1  ;;  %458 = vmatprep.mubr.msk.bf16.mxu0 %vm649_vm0, %v648_v1  ;;  %v100_v3 = vunpack.c.l.s4 %v650_v2  ;;  %vm125_vm1 = vcmask 1043456   ;;  %v85_v7 = vld [vmem:[#allocation5] sm:$0xf]  ;;  %v81_v8 = vld [vmem:[#allocation2] sm:$0x1]  ;;  %v517_v17 = vld [vmem:[#allocation7 + $0x30] sm:$0xff]  }
  0x38   :  { %v103_v4 = vshrl.u32 %v102_v0, 7  ;;  %462 = vmatprep.subr.bf16.mxu1 %v648_v1  ;;  %478 = vmatprep.mubr.msk.bf16.mxu1 %vm649_vm0, %v648_v1  ;;  %v82_v9 = vld [vmem:[#allocation2 + $0x1] sm:$0x1]  ;;  %v127_v10 = vsel %vm125_vm1, %v85_v7, 0  ;;  %v83_v11 = vld [vmem:[#allocation2 + $0x2] sm:$0x1] }
  0x39   :  { %v101_v5 = vunpack.c.0.s8 %v100_v3  ;;  %v84_v12 = vld [vmem:[#allocation2 + $0x3] sm:$0x1]  ;;  %v97_v13 = vcombine.low %v81_v8, %v82_v9  ;;  %457 = vmatpush3.bf16.msra.mxu0 %v127_v10  ;;  %vm121_vm2 = vcmask 64512   ;;  %v518_v20 = vld [vmem:[#allocation7 + $0x28] sm:$0xff]   ;;  %v519_v22 = vld [vmem:[#allocation7 + $0x20] sm:$0xff]   ;;  %vm395_vm3 = vcmask 31744  }
  0x3a   :  { %v516_v14 = vld [vmem:[#allocation7 + $0x38] sm:$0xff]   ;;  %v98_v15 = vcombine.low %v83_v11, %v84_v12  ;;  %482 = vmatprep.subr.bf16.mxu0 %v648_v1  ;;  %v521_v24 = vld [vmem:[#allocation7 + $0x10] sm:$0xff]   ;;  %v522_v25 = vld [vmem:[#allocation7 + $0x8] sm:$0xff]  }
  0x3b   :  { %v104_v6 = vsub.s32 %v101_v5, %v103_v4  ;;  %463 = vmatpush3.bf16.msra.mxu1 %v516_v14  ;;  %v520_v23 = vld [vmem:[#allocation7 + $0x18] sm:$0xff]   ;;  %v523_v26 = vld [vmem:[#allocation7] sm:$0xff]   ;;  %v525_v28 = vld [vmem:[#allocation8 + $0x30] sm:$0xff]  }
  0x3c   :  { %464 = vmatprep.subr.bf16.mxu1 %v648_v1  ;;  %v524_v27 = vld [vmem:[#allocation8 + $0x38] sm:$0xff]   ;;  %v526_v29 = vld [vmem:[#allocation8 + $0x28] sm:$0xff]   ;;  %v527_v30 = vld [vmem:[#allocation8 + $0x20] sm:$0xff]  }
  0x3d   :  { %v105_v16 = vrot.slane %v97_v13, %v104_v6  ;;  %v112_v18 = vrot.slane %v98_v15, %v104_v6  ;;  %v528_v31 = vld [vmem:[#allocation8 + $0x18] sm:$0xff]   ;;  %v529_v32 = vld [vmem:[#allocation8 + $0x10] sm:$0xff]   ;;  %v530_v41 = vld [vmem:[#allocation8 + $0x8] sm:$0xff]  }
  0x3e   :  { %v416_v33 = vld [vmem:[%s743_s2] ss:$0 sm:$0xff]  ;;  %v531_v42 = vld [vmem:[#allocation8] sm:$0xff]  }
  0x3f   :  { %v113_v19 = vcombine.low %v105_v16, %v112_v18  ;;  %465 = vmatpush3.bf16.msra.mxu1 %v517_v17  ;;  %v418_v43 = vld [vmem:[%s745_s4] ss:$0 sm:$0xff] }
  0x40   :  { %466 = vmatprep.subr.bf16.mxu1 %v648_v1  ;;  %v427_v51 = vld [vmem:[%s747_s6] ss:$0 sm:$0xff] }
  0x41   :  { %v120_v21 = vrot.slane %v113_v19, %v104_v6 }
  0x43   :  { %459 = vmatmul.mubr.msk.bf16.vlgmr.msra.gmra.mxu0 %vm121_vm2, %v120_v21  ;;  %467 = vmatpush3.bf16.msra.mxu1 %v518_v20 }
  0x44   :  { %498 = vmatprep.mubr.msk.bf16.mxu0 %vm649_vm0, %v648_v1  ;;  %468 = vmatprep.subr.bf16.mxu1 %v648_v1 }
  0x45   :  { %483 = vmatpush3.bf16.msra.mxu0 %v524_v27 }
  0x46   :  { %484 = vmatprep.subr.bf16.mxu0 %v648_v1 }
  0x47   :  { %469 = vmatpush3.bf16.msra.mxu1 %v519_v22 }
  0x48   :  { %470 = vmatprep.subr.bf16.mxu1 %v648_v1 }
  0x49   :  { %485 = vmatpush3.bf16.msra.mxu0 %v525_v28 }
  0x4a   :  { %486 = vmatprep.subr.bf16.mxu0 %v648_v1 }
  0x4b   :  { %471 = vmatpush3.bf16.msra.mxu1 %v520_v23 }
  0x4c   :  { %472 = vmatprep.subr.bf16.mxu1 %v648_v1 }
  0x4d   :  { %487 = vmatpush3.bf16.msra.mxu0 %v526_v29 }
  0x4e   :  { %488 = vmatprep.subr.bf16.mxu0 %v648_v1 }
  0x4f   :  { %473 = vmatpush3.bf16.msra.mxu1 %v521_v24 }
  0x50   :  { %474 = vmatprep.subr.bf16.mxu1 %v648_v1 }
  0x51   :  { %489 = vmatpush3.bf16.msra.mxu0 %v527_v30 }
  0x52   :  { %490 = vmatprep.subr.bf16.mxu0 %v648_v1 }
  0x53   :  { %475 = vmatpush3.bf16.msra.mxu1 %v522_v25 }
  0x54   :  { %476 = vmatprep.subr.bf16.mxu1 %v648_v1 }
  0x55   :  { %491 = vmatpush3.bf16.msra.mxu0 %v528_v31 }
  0x56   :  { %492 = vmatprep.subr.bf16.mxu0 %v648_v1 }
  0x57   :  { %477 = vmatpush3.bf16.msra.mxu1 %v523_v26 }
  0x59   :  { %493 = vmatpush3.bf16.msra.mxu0 %v529_v32 }
  0x5a   :  { %494 = vmatprep.subr.bf16.mxu0 %v648_v1 }
  0x5d   :  { %495 = vmatpush3.bf16.msra.mxu0 %v530_v41 }
  0x5e   :  { %496 = vmatprep.subr.bf16.mxu0 %v648_v1 }
  0x61   :  { %497 = vmatpush3.bf16.msra.mxu0 %v531_v42 }
 0x103   :  { %v163_v34 = vpop.f32.mrf.mxu0 }
 0x104   :  { %v164_v35 = vadd.f32 %v416_v33, %v163_v34 }
 0x105   :  { %v460_v36 = vpop.f32.mrf.mxu0 }
 0x106   :  { %v169_v37 = vmax.f32 %v164_v35, 0.0 }
 0x107   :  { %v166_v38 = vpop.f32.mrf.mxu0 }
 0x108   :  { %v170_v39 = vpack.c.bf16 %v169_v37, %v169_v37 }
 0x109   :  { %v461_v40 = vpop.f32.mrf.mxu0 }
 0x10a   :  { %479 = vmatmul.mubr.bf16.vlgmr.msra.gmra.mxu1 %v170_v39 }
 0x1ca   :  { %v276_v44 = vpop.f32.mrf.mxu1 }
 0x1cb   :  { %v277_v45 = vadd.f32 %v418_v43, %v276_v44 }
 0x1cc   :  { %v480_v46 = vpop.f32.mrf.mxu1 }
 0x1cd   :  { %v282_v47 = vmax.f32 %v277_v45, 0.0 }
 0x1ce   :  { %v279_v48 = vpop.f32.mrf.mxu1 }
 0x1cf   :  { %v283_v49 = vpack.c.bf16 %v282_v47, %v282_v47 }
 0x1d0   :  { %v481_v50 = vpop.f32.mrf.mxu1 }
 0x1d1   :  { %499 = vmatmul.mubr.bf16.vlgmr.msra.gmra.mxu0 %v283_v49 }
 0x291   :  { %v389_v52 = vpop.f32.mrf.mxu0 }
 0x292   :  { %v390_v53 = vadd.f32 %v427_v51, %v389_v52 }
 0x293   :  { %v500_v54 = vpop.f32.mrf.mxu0 }
 0x294   :  { %396 = vst.msk [vmem:[#allocation10] sm:$0xff] %vm395_vm3, %v390_v53 }
 0x295   :  { %v392_v55 = vpop.f32.mrf.mxu0 }
 0x297   :  { %v501_v56 = vpop.f32.mrf.mxu0 }
 0x298   :  { %401 = vsyncadd [#allocation4], 96  ;;  %s651_s4 = smov [#allocation10]  }
 0x299   :  { %s402_s27 = sshll.u32 %s651_s4, 4  ;;  %s403_s27 = int_to_ptr.vmem [resolvable:$true] %s402_s27 }
 0x29a   :  { %s612_s28 = scalar_lea.vmem %s403_s27, 32  ;;  %s616_s29 = scalar_lea.vmem %s403_s27, 128 }
 0x29b   :  { %p613_p6 = scmp.ne.s32.totalorder %s403_s27, %s612_s28  ;;  %p617_p7 = scmp.lt.s32.totalorder %s403_s27, %s403_s27 }
 0x29c   :  { %p618_p8 = scmp.lt.s32.totalorder %s616_s29, %s612_s28 }
 0x29e   :  { %p619_p9 = por %p618_p8, %p617_p7 }
 0x2a0   :  { %p620_p10 = pnand %p619_p9, %p613_p6 }
 0x2a2   :  { %623 = shalt.err (!%p620_p10)
}
 0x2a3   :  { %s652_s6 = smov 32   ;;  %s653_s30 = smov 2  }
 0x2a4   :  { %408 = dma.vmem_to_hbm [thread:$0]  %s403_s27, 32, %s748_s7, [#allocation4], %s652_s6, %s652_s6, %s653_s30  }
 0x2a5   :  { %638 = dma.done.wait [#allocation4], 128  }
 0x2a6   :  { %639 = vsyncadd [#allocation4], 4294967168 }
 0x2a7   :  { %412 = vsyncpa [#allocation3], 1 }
 0x2a8   :  { %413 = vsyncpa [#allocation6], 1 }
 0x2a9   :  { %414 = vsyncpa [#allocation9], 1 }
 0x2aa   :  { %415 = vsyncpa [#allocation4], 1 }

</bundles_post_ra>
